<compile_context>
chip_gen: v6e
topology: v6e:2x2x1
jax: 0.10.0
libtpu: 0.0.40
codegen_flags: <defaults>
</compile_context>

<pallas_src>
import functools

import jax
import jax.numpy as jnp
from jax.experimental import pallas as pl
from jax.experimental.pallas import tpu as pltpu

DIM_INPUT = 5
DIM_HIDDEN = 6
DIM_OUTPUT = 1

# Packed-parameter layout (flat f32 vector, PyTorch (out_features, in_features) order).
W1_OFF = 0
B1_OFF = W1_OFF + DIM_HIDDEN * DIM_INPUT          # 30
W2_OFF = B1_OFF + DIM_HIDDEN                      # 36
B2_OFF = W2_OFF + DIM_HIDDEN * DIM_HIDDEN         # 72
W3_OFF = B2_OFF + DIM_HIDDEN                      # 78
B3_OFF = W3_OFF + DIM_OUTPUT * DIM_HIDDEN         # 84
N_PARAMS = B3_OFF + DIM_OUTPUT                    # 85


def controller_kernel(p_ref, x_ref, o_ref):
    """One batch-block of the fused MLP.

    p_ref : SMEM f32[N_PARAMS]       packed W1,b1,W2,b2,W3,b3
    x_ref : VMEM f32[DIM_INPUT, TB]  batch on lanes
    o_ref : VMEM f32[DIM_OUTPUT, TB] batch on lanes
    """
    # Lane-dense (1, TB) input rows.
    x_rows = [x_ref[pl.ds(k, 1), :] for k in range(DIM_INPUT)]

    # Layer 1: (5 -> 6), unrolled scalar*vector FMA chain on the VPU.
    h1 = []
    for j in range(DIM_HIDDEN):
        acc = x_rows[0] * p_ref[W1_OFF + j * DIM_INPUT]
        for k in range(1, DIM_INPUT):
            acc = acc + x_rows[k] * p_ref[W1_OFF + j * DIM_INPUT + k]
        h1.append(jnp.tanh(acc + p_ref[B1_OFF + j]))

    # Layer 2: (6 -> 6)
    h2 = []
    for j in range(DIM_HIDDEN):
        acc = h1[0] * p_ref[W2_OFF + j * DIM_HIDDEN]
        for k in range(1, DIM_HIDDEN):
            acc = acc + h1[k] * p_ref[W2_OFF + j * DIM_HIDDEN + k]
        h2.append(jnp.tanh(acc + p_ref[B2_OFF + j]))

    # Layer 3: (6 -> 1) + sigmoid + *1000
    acc = h2[0] * p_ref[W3_OFF]
    for k in range(1, DIM_HIDDEN):
        acc = acc + h2[k] * p_ref[W3_OFF + k]
    logits = acc + p_ref[B3_OFF]
    o_ref[...] = (jax.nn.sigmoid(logits) * 1000.0).astype(o_ref.dtype)


def _round_up(n, m):
    return ((n + m - 1) // m) * m


@functools.partial(jax.jit, static_argnames=("block_b",))
def controller_forward(state, packed_params, *, block_b=512):
    """state: (batch, DIM_INPUT) f32 -> (batch, DIM_OUTPUT) f32 (PyTorch semantics)."""
    batch = state.shape[0]
    tb = min(block_b, _round_up(batch, 128))          # lane-block, multiple of 128
    padded = _round_up(batch, tb)

    # Batch-on-lanes layout for the kernel; pad batch to a whole number of blocks.
    x = state.T.astype(jnp.float32)                   # (DIM_INPUT, batch)
    if padded != batch:
        x = jnp.pad(x, ((0, 0), (0, padded - batch)))

    out = pl.pallas_call(
        controller_kernel,
        out_shape=jax.ShapeDtypeStruct((DIM_OUTPUT, padded), jnp.float32),
        grid=(padded // tb,),
        in_specs=[
            pl.BlockSpec(memory_space=pltpu.MemorySpace.SMEM),   # packed params (whole)
            pl.BlockSpec((DIM_INPUT, tb), lambda i: (0, i)),     # batch block of x
        ],
        out_specs=pl.BlockSpec((DIM_OUTPUT, tb), lambda i: (0, i)),
        compiler_params=pltpu.CompilerParams(
            dimension_semantics=("parallel",)),
    )(packed_params, x)

    return out[:, :batch].T                           # (batch, DIM_OUTPUT)


def init_params(key):
    """PyTorch nn.Linear default init: U[-1/sqrt(fan_in), +1/sqrt(fan_in)]; W is (out, in)."""
    def linear(k, fan_in, fan_out):
        kw, kb = jax.random.split(k)
        bound = 1.0 / (fan_in ** 0.5)
        w = jax.random.uniform(kw, (fan_out, fan_in), jnp.float32, -bound, bound)
        b = jax.random.uniform(kb, (fan_out,), jnp.float32, -bound, bound)
        return w, b

    k1, k2, k3 = jax.random.split(key, 3)
    w1, b1 = linear(k1, DIM_INPUT, DIM_HIDDEN)
    w2, b2 = linear(k2, DIM_HIDDEN, DIM_HIDDEN)
    w3, b3 = linear(k3, DIM_HIDDEN, DIM_OUTPUT)
    return (w1, b1, w2, b2, w3, b3)


def pack_params(params):
    flat = jnp.concatenate([p.reshape(-1).astype(jnp.float32) for p in params])
    assert flat.shape == (N_PARAMS,)
    return flat


if __name__ == "__main__":
    key = jax.random.PRNGKey(0)
    k_params, k_state = jax.random.split(key)

    params = init_params(k_params)
    packed = pack_params(params)

    def reference(state):
        w1, b1, w2, b2, w3, b3 = params
        h1 = jnp.tanh(state @ w1.T + b1)
        h2 = jnp.tanh(h1 @ w2.T + b2)
        return jax.nn.sigmoid(h2 @ w3.T + b3) * 1000.0

    # Small per-timestep batch (typical RL rollout size).
    batch = 8
    state = jax.random.normal(k_state, (batch, DIM_INPUT), jnp.float32)
    action = controller_forward(state, packed)
    jax.block_until_ready(action)
    assert action.shape == (batch, DIM_OUTPUT)
    assert jnp.allclose(action, reference(state), atol=1e-3, rtol=1e-4)

    # Multi-block batch to exercise the pipelined grid + padding path.
    batch2 = 600
    state2 = jax.random.normal(jax.random.PRNGKey(1), (batch2, DIM_INPUT), jnp.float32)
    action2 = controller_forward(state2, packed)
    jax.block_until_ready(action2)
    assert action2.shape == (batch2, DIM_OUTPUT)
    assert jnp.allclose(action2, reference(state2), atol=1e-3, rtol=1e-4)

    print("KERNEL_OK")
</pallas_src>

<mosaic_0001>
module attributes {stable_mosaic.version = 11 : i64} {
  func.func @controller_kernel(%arg0: i32, %arg1: memref<85xf32, #tpu.memory_space<smem>>, %arg2: memref<5x128xf32, #tpu.memory_space<vmem>>, %arg3: memref<1x128xf32, #tpu.memory_space<vmem>>) attributes {dimension_semantics = [#tpu.dimension_semantics<parallel>], iteration_bounds = array<i64: 1>, scalar_prefetch = 0 : i64, scratch_operands = 0 : i64, tpu.core_type = #tpu.core_type<tc>, window_params = [{transform_indices = @transform_0, window_bounds = array<i64: 85>}, {transform_indices = @transform_1, window_bounds = array<i64: 5, 128>}, {transform_indices = @transform_2, window_bounds = array<i64: 1, 128>}]} {
    %c0 = arith.constant 0 : index
    %c0_0 = arith.constant 0 : index
    %0 = vector.load %arg2[%c0, %c0_0] : memref<5x128xf32, #tpu.memory_space<vmem>>, vector<1x128xf32>
    %c1 = arith.constant 1 : index
    %c0_1 = arith.constant 0 : index
    %1 = vector.load %arg2[%c1, %c0_1] : memref<5x128xf32, #tpu.memory_space<vmem>>, vector<1x128xf32>
    %c2 = arith.constant 2 : index
    %c0_2 = arith.constant 0 : index
    %2 = vector.load %arg2[%c2, %c0_2] : memref<5x128xf32, #tpu.memory_space<vmem>>, vector<1x128xf32>
    %c3 = arith.constant 3 : index
    %c0_3 = arith.constant 0 : index
    %3 = vector.load %arg2[%c3, %c0_3] : memref<5x128xf32, #tpu.memory_space<vmem>>, vector<1x128xf32>
    %c4 = arith.constant 4 : index
    %c0_4 = arith.constant 0 : index
    %4 = vector.load %arg2[%c4, %c0_4] : memref<5x128xf32, #tpu.memory_space<vmem>>, vector<1x128xf32>
    %c0_5 = arith.constant 0 : index
    %5 = memref.load %arg1[%c0_5] : memref<85xf32, #tpu.memory_space<smem>>
    %6 = vector.broadcast %5 : f32 to vector<1x128xf32>
    %7 = arith.mulf %0, %6 : vector<1x128xf32>
    %c1_6 = arith.constant 1 : index
    %8 = memref.load %arg1[%c1_6] : memref<85xf32, #tpu.memory_space<smem>>
    %9 = vector.broadcast %8 : f32 to vector<1x128xf32>
    %10 = arith.mulf %1, %9 : vector<1x128xf32>
    %11 = arith.addf %7, %10 : vector<1x128xf32>
    %c2_7 = arith.constant 2 : index
    %12 = memref.load %arg1[%c2_7] : memref<85xf32, #tpu.memory_space<smem>>
    %13 = vector.broadcast %12 : f32 to vector<1x128xf32>
    %14 = arith.mulf %2, %13 : vector<1x128xf32>
    %15 = arith.addf %11, %14 : vector<1x128xf32>
    %c3_8 = arith.constant 3 : index
    %16 = memref.load %arg1[%c3_8] : memref<85xf32, #tpu.memory_space<smem>>
    %17 = vector.broadcast %16 : f32 to vector<1x128xf32>
    %18 = arith.mulf %3, %17 : vector<1x128xf32>
    %19 = arith.addf %15, %18 : vector<1x128xf32>
    %c4_9 = arith.constant 4 : index
    %20 = memref.load %arg1[%c4_9] : memref<85xf32, #tpu.memory_space<smem>>
    %21 = vector.broadcast %20 : f32 to vector<1x128xf32>
    %22 = arith.mulf %4, %21 : vector<1x128xf32>
    %23 = arith.addf %19, %22 : vector<1x128xf32>
    %c30 = arith.constant 30 : index
    %24 = memref.load %arg1[%c30] : memref<85xf32, #tpu.memory_space<smem>>
    %25 = vector.broadcast %24 : f32 to vector<1x128xf32>
    %26 = arith.addf %23, %25 : vector<1x128xf32>
    %27 = math.tanh %26 : vector<1x128xf32>
    %c5 = arith.constant 5 : index
    %28 = memref.load %arg1[%c5] : memref<85xf32, #tpu.memory_space<smem>>
    %29 = vector.broadcast %28 : f32 to vector<1x128xf32>
    %30 = arith.mulf %0, %29 : vector<1x128xf32>
    %c6 = arith.constant 6 : index
    %31 = memref.load %arg1[%c6] : memref<85xf32, #tpu.memory_space<smem>>
    %32 = vector.broadcast %31 : f32 to vector<1x128xf32>
    %33 = arith.mulf %1, %32 : vector<1x128xf32>
    %34 = arith.addf %30, %33 : vector<1x128xf32>
    %c7 = arith.constant 7 : index
    %35 = memref.load %arg1[%c7] : memref<85xf32, #tpu.memory_space<smem>>
    %36 = vector.broadcast %35 : f32 to vector<1x128xf32>
    %37 = arith.mulf %2, %36 : vector<1x128xf32>
    %38 = arith.addf %34, %37 : vector<1x128xf32>
    %c8 = arith.constant 8 : index
    %39 = memref.load %arg1[%c8] : memref<85xf32, #tpu.memory_space<smem>>
    %40 = vector.broadcast %39 : f32 to vector<1x128xf32>
    %41 = arith.mulf %3, %40 : vector<1x128xf32>
    %42 = arith.addf %38, %41 : vector<1x128xf32>
    %c9 = arith.constant 9 : index
    %43 = memref.load %arg1[%c9] : memref<85xf32, #tpu.memory_space<smem>>
    %44 = vector.broadcast %43 : f32 to vector<1x128xf32>
    %45 = arith.mulf %4, %44 : vector<1x128xf32>
    %46 = arith.addf %42, %45 : vector<1x128xf32>
    %c31 = arith.constant 31 : index
    %47 = memref.load %arg1[%c31] : memref<85xf32, #tpu.memory_space<smem>>
    %48 = vector.broadcast %47 : f32 to vector<1x128xf32>
    %49 = arith.addf %46, %48 : vector<1x128xf32>
    %50 = math.tanh %49 : vector<1x128xf32>
    %c10 = arith.constant 10 : index
    %51 = memref.load %arg1[%c10] : memref<85xf32, #tpu.memory_space<smem>>
    %52 = vector.broadcast %51 : f32 to vector<1x128xf32>
    %53 = arith.mulf %0, %52 : vector<1x128xf32>
    %c11 = arith.constant 11 : index
    %54 = memref.load %arg1[%c11] : memref<85xf32, #tpu.memory_space<smem>>
    %55 = vector.broadcast %54 : f32 to vector<1x128xf32>
    %56 = arith.mulf %1, %55 : vector<1x128xf32>
    %57 = arith.addf %53, %56 : vector<1x128xf32>
    %c12 = arith.constant 12 : index
    %58 = memref.load %arg1[%c12] : memref<85xf32, #tpu.memory_space<smem>>
    %59 = vector.broadcast %58 : f32 to vector<1x128xf32>
    %60 = arith.mulf %2, %59 : vector<1x128xf32>
    %61 = arith.addf %57, %60 : vector<1x128xf32>
    %c13 = arith.constant 13 : index
    %62 = memref.load %arg1[%c13] : memref<85xf32, #tpu.memory_space<smem>>
    %63 = vector.broadcast %62 : f32 to vector<1x128xf32>
    %64 = arith.mulf %3, %63 : vector<1x128xf32>
    %65 = arith.addf %61, %64 : vector<1x128xf32>
    %c14 = arith.constant 14 : index
    %66 = memref.load %arg1[%c14] : memref<85xf32, #tpu.memory_space<smem>>
    %67 = vector.broadcast %66 : f32 to vector<1x128xf32>
    %68 = arith.mulf %4, %67 : vector<1x128xf32>
    %69 = arith.addf %65, %68 : vector<1x128xf32>
    %c32 = arith.constant 32 : index
    %70 = memref.load %arg1[%c32] : memref<85xf32, #tpu.memory_space<smem>>
    %71 = vector.broadcast %70 : f32 to vector<1x128xf32>
    %72 = arith.addf %69, %71 : vector<1x128xf32>
    %73 = math.tanh %72 : vector<1x128xf32>
    %c15 = arith.constant 15 : index
    %74 = memref.load %arg1[%c15] : memref<85xf32, #tpu.memory_space<smem>>
    %75 = vector.broadcast %74 : f32 to vector<1x128xf32>
    %76 = arith.mulf %0, %75 : vector<1x128xf32>
    %c16 = arith.constant 16 : index
    %77 = memref.load %arg1[%c16] : memref<85xf32, #tpu.memory_space<smem>>
    %78 = vector.broadcast %77 : f32 to vector<1x128xf32>
    %79 = arith.mulf %1, %78 : vector<1x128xf32>
    %80 = arith.addf %76, %79 : vector<1x128xf32>
    %c17 = arith.constant 17 : index
    %81 = memref.load %arg1[%c17] : memref<85xf32, #tpu.memory_space<smem>>
    %82 = vector.broadcast %81 : f32 to vector<1x128xf32>
    %83 = arith.mulf %2, %82 : vector<1x128xf32>
    %84 = arith.addf %80, %83 : vector<1x128xf32>
    %c18 = arith.constant 18 : index
    %85 = memref.load %arg1[%c18] : memref<85xf32, #tpu.memory_space<smem>>
    %86 = vector.broadcast %85 : f32 to vector<1x128xf32>
    %87 = arith.mulf %3, %86 : vector<1x128xf32>
    %88 = arith.addf %84, %87 : vector<1x128xf32>
    %c19 = arith.constant 19 : index
    %89 = memref.load %arg1[%c19] : memref<85xf32, #tpu.memory_space<smem>>
    %90 = vector.broadcast %89 : f32 to vector<1x128xf32>
    %91 = arith.mulf %4, %90 : vector<1x128xf32>
    %92 = arith.addf %88, %91 : vector<1x128xf32>
    %c33 = arith.constant 33 : index
    %93 = memref.load %arg1[%c33] : memref<85xf32, #tpu.memory_space<smem>>
    %94 = vector.broadcast %93 : f32 to vector<1x128xf32>
    %95 = arith.addf %92, %94 : vector<1x128xf32>
    %96 = math.tanh %95 : vector<1x128xf32>
    %c20 = arith.constant 20 : index
    %97 = memref.load %arg1[%c20] : memref<85xf32, #tpu.memory_space<smem>>
    %98 = vector.broadcast %97 : f32 to vector<1x128xf32>
    %99 = arith.mulf %0, %98 : vector<1x128xf32>
    %c21 = arith.constant 21 : index
    %100 = memref.load %arg1[%c21] : memref<85xf32, #tpu.memory_space<smem>>
    %101 = vector.broadcast %100 : f32 to vector<1x128xf32>
    %102 = arith.mulf %1, %101 : vector<1x128xf32>
    %103 = arith.addf %99, %102 : vector<1x128xf32>
    %c22 = arith.constant 22 : index
    %104 = memref.load %arg1[%c22] : memref<85xf32, #tpu.memory_space<smem>>
    %105 = vector.broadcast %104 : f32 to vector<1x128xf32>
    %106 = arith.mulf %2, %105 : vector<1x128xf32>
    %107 = arith.addf %103, %106 : vector<1x128xf32>
    %c23 = arith.constant 23 : index
    %108 = memref.load %arg1[%c23] : memref<85xf32, #tpu.memory_space<smem>>
    %109 = vector.broadcast %108 : f32 to vector<1x128xf32>
    %110 = arith.mulf %3, %109 : vector<1x128xf32>
    %111 = arith.addf %107, %110 : vector<1x128xf32>
    %c24 = arith.constant 24 : index
    %112 = memref.load %arg1[%c24] : memref<85xf32, #tpu.memory_space<smem>>
    %113 = vector.broadcast %112 : f32 to vector<1x128xf32>
    %114 = arith.mulf %4, %113 : vector<1x128xf32>
    %115 = arith.addf %111, %114 : vector<1x128xf32>
    %c34 = arith.constant 34 : index
    %116 = memref.load %arg1[%c34] : memref<85xf32, #tpu.memory_space<smem>>
    %117 = vector.broadcast %116 : f32 to vector<1x128xf32>
    %118 = arith.addf %115, %117 : vector<1x128xf32>
    %119 = math.tanh %118 : vector<1x128xf32>
    %c25 = arith.constant 25 : index
    %120 = memref.load %arg1[%c25] : memref<85xf32, #tpu.memory_space<smem>>
    %121 = vector.broadcast %120 : f32 to vector<1x128xf32>
    %122 = arith.mulf %0, %121 : vector<1x128xf32>
    %c26 = arith.constant 26 : index
    %123 = memref.load %arg1[%c26] : memref<85xf32, #tpu.memory_space<smem>>
    %124 = vector.broadcast %123 : f32 to vector<1x128xf32>
    %125 = arith.mulf %1, %124 : vector<1x128xf32>
    %126 = arith.addf %122, %125 : vector<1x128xf32>
    %c27 = arith.constant 27 : index
    %127 = memref.load %arg1[%c27] : memref<85xf32, #tpu.memory_space<smem>>
    %128 = vector.broadcast %127 : f32 to vector<1x128xf32>
    %129 = arith.mulf %2, %128 : vector<1x128xf32>
    %130 = arith.addf %126, %129 : vector<1x128xf32>
    %c28 = arith.constant 28 : index
    %131 = memref.load %arg1[%c28] : memref<85xf32, #tpu.memory_space<smem>>
    %132 = vector.broadcast %131 : f32 to vector<1x128xf32>
    %133 = arith.mulf %3, %132 : vector<1x128xf32>
    %134 = arith.addf %130, %133 : vector<1x128xf32>
    %c29 = arith.constant 29 : index
    %135 = memref.load %arg1[%c29] : memref<85xf32, #tpu.memory_space<smem>>
    %136 = vector.broadcast %135 : f32 to vector<1x128xf32>
    %137 = arith.mulf %4, %136 : vector<1x128xf32>
    %138 = arith.addf %134, %137 : vector<1x128xf32>
    %c35 = arith.constant 35 : index
    %139 = memref.load %arg1[%c35] : memref<85xf32, #tpu.memory_space<smem>>
    %140 = vector.broadcast %139 : f32 to vector<1x128xf32>
    %141 = arith.addf %138, %140 : vector<1x128xf32>
    %142 = math.tanh %141 : vector<1x128xf32>
    %c36 = arith.constant 36 : index
    %143 = memref.load %arg1[%c36] : memref<85xf32, #tpu.memory_space<smem>>
    %144 = vector.broadcast %143 : f32 to vector<1x128xf32>
    %145 = arith.mulf %27, %144 : vector<1x128xf32>
    %c37 = arith.constant 37 : index
    %146 = memref.load %arg1[%c37] : memref<85xf32, #tpu.memory_space<smem>>
    %147 = vector.broadcast %146 : f32 to vector<1x128xf32>
    %148 = arith.mulf %50, %147 : vector<1x128xf32>
    %149 = arith.addf %145, %148 : vector<1x128xf32>
    %c38 = arith.constant 38 : index
    %150 = memref.load %arg1[%c38] : memref<85xf32, #tpu.memory_space<smem>>
    %151 = vector.broadcast %150 : f32 to vector<1x128xf32>
    %152 = arith.mulf %73, %151 : vector<1x128xf32>
    %153 = arith.addf %149, %152 : vector<1x128xf32>
    %c39 = arith.constant 39 : index
    %154 = memref.load %arg1[%c39] : memref<85xf32, #tpu.memory_space<smem>>
    %155 = vector.broadcast %154 : f32 to vector<1x128xf32>
    %156 = arith.mulf %96, %155 : vector<1x128xf32>
    %157 = arith.addf %153, %156 : vector<1x128xf32>
    %c40 = arith.constant 40 : index
    %158 = memref.load %arg1[%c40] : memref<85xf32, #tpu.memory_space<smem>>
    %159 = vector.broadcast %158 : f32 to vector<1x128xf32>
    %160 = arith.mulf %119, %159 : vector<1x128xf32>
    %161 = arith.addf %157, %160 : vector<1x128xf32>
    %c41 = arith.constant 41 : index
    %162 = memref.load %arg1[%c41] : memref<85xf32, #tpu.memory_space<smem>>
    %163 = vector.broadcast %162 : f32 to vector<1x128xf32>
    %164 = arith.mulf %142, %163 : vector<1x128xf32>
    %165 = arith.addf %161, %164 : vector<1x128xf32>
    %c72 = arith.constant 72 : index
    %166 = memref.load %arg1[%c72] : memref<85xf32, #tpu.memory_space<smem>>
    %167 = vector.broadcast %166 : f32 to vector<1x128xf32>
    %168 = arith.addf %165, %167 : vector<1x128xf32>
    %169 = math.tanh %168 : vector<1x128xf32>
    %c42 = arith.constant 42 : index
    %170 = memref.load %arg1[%c42] : memref<85xf32, #tpu.memory_space<smem>>
    %171 = vector.broadcast %170 : f32 to vector<1x128xf32>
    %172 = arith.mulf %27, %171 : vector<1x128xf32>
    %c43 = arith.constant 43 : index
    %173 = memref.load %arg1[%c43] : memref<85xf32, #tpu.memory_space<smem>>
    %174 = vector.broadcast %173 : f32 to vector<1x128xf32>
    %175 = arith.mulf %50, %174 : vector<1x128xf32>
    %176 = arith.addf %172, %175 : vector<1x128xf32>
    %c44 = arith.constant 44 : index
    %177 = memref.load %arg1[%c44] : memref<85xf32, #tpu.memory_space<smem>>
    %178 = vector.broadcast %177 : f32 to vector<1x128xf32>
    %179 = arith.mulf %73, %178 : vector<1x128xf32>
    %180 = arith.addf %176, %179 : vector<1x128xf32>
    %c45 = arith.constant 45 : index
    %181 = memref.load %arg1[%c45] : memref<85xf32, #tpu.memory_space<smem>>
    %182 = vector.broadcast %181 : f32 to vector<1x128xf32>
    %183 = arith.mulf %96, %182 : vector<1x128xf32>
    %184 = arith.addf %180, %183 : vector<1x128xf32>
    %c46 = arith.constant 46 : index
    %185 = memref.load %arg1[%c46] : memref<85xf32, #tpu.memory_space<smem>>
    %186 = vector.broadcast %185 : f32 to vector<1x128xf32>
    %187 = arith.mulf %119, %186 : vector<1x128xf32>
    %188 = arith.addf %184, %187 : vector<1x128xf32>
    %c47 = arith.constant 47 : index
    %189 = memref.load %arg1[%c47] : memref<85xf32, #tpu.memory_space<smem>>
    %190 = vector.broadcast %189 : f32 to vector<1x128xf32>
    %191 = arith.mulf %142, %190 : vector<1x128xf32>
    %192 = arith.addf %188, %191 : vector<1x128xf32>
    %c73 = arith.constant 73 : index
    %193 = memref.load %arg1[%c73] : memref<85xf32, #tpu.memory_space<smem>>
    %194 = vector.broadcast %193 : f32 to vector<1x128xf32>
    %195 = arith.addf %192, %194 : vector<1x128xf32>
    %196 = math.tanh %195 : vector<1x128xf32>
    %c48 = arith.constant 48 : index
    %197 = memref.load %arg1[%c48] : memref<85xf32, #tpu.memory_space<smem>>
    %198 = vector.broadcast %197 : f32 to vector<1x128xf32>
    %199 = arith.mulf %27, %198 : vector<1x128xf32>
    %c49 = arith.constant 49 : index
    %200 = memref.load %arg1[%c49] : memref<85xf32, #tpu.memory_space<smem>>
    %201 = vector.broadcast %200 : f32 to vector<1x128xf32>
    %202 = arith.mulf %50, %201 : vector<1x128xf32>
    %203 = arith.addf %199, %202 : vector<1x128xf32>
    %c50 = arith.constant 50 : index
    %204 = memref.load %arg1[%c50] : memref<85xf32, #tpu.memory_space<smem>>
    %205 = vector.broadcast %204 : f32 to vector<1x128xf32>
    %206 = arith.mulf %73, %205 : vector<1x128xf32>
    %207 = arith.addf %203, %206 : vector<1x128xf32>
    %c51 = arith.constant 51 : index
    %208 = memref.load %arg1[%c51] : memref<85xf32, #tpu.memory_space<smem>>
    %209 = vector.broadcast %208 : f32 to vector<1x128xf32>
    %210 = arith.mulf %96, %209 : vector<1x128xf32>
    %211 = arith.addf %207, %210 : vector<1x128xf32>
    %c52 = arith.constant 52 : index
    %212 = memref.load %arg1[%c52] : memref<85xf32, #tpu.memory_space<smem>>
    %213 = vector.broadcast %212 : f32 to vector<1x128xf32>
    %214 = arith.mulf %119, %213 : vector<1x128xf32>
    %215 = arith.addf %211, %214 : vector<1x128xf32>
    %c53 = arith.constant 53 : index
    %216 = memref.load %arg1[%c53] : memref<85xf32, #tpu.memory_space<smem>>
    %217 = vector.broadcast %216 : f32 to vector<1x128xf32>
    %218 = arith.mulf %142, %217 : vector<1x128xf32>
    %219 = arith.addf %215, %218 : vector<1x128xf32>
    %c74 = arith.constant 74 : index
    %220 = memref.load %arg1[%c74] : memref<85xf32, #tpu.memory_space<smem>>
    %221 = vector.broadcast %220 : f32 to vector<1x128xf32>
    %222 = arith.addf %219, %221 : vector<1x128xf32>
    %223 = math.tanh %222 : vector<1x128xf32>
    %c54 = arith.constant 54 : index
    %224 = memref.load %arg1[%c54] : memref<85xf32, #tpu.memory_space<smem>>
    %225 = vector.broadcast %224 : f32 to vector<1x128xf32>
    %226 = arith.mulf %27, %225 : vector<1x128xf32>
    %c55 = arith.constant 55 : index
    %227 = memref.load %arg1[%c55] : memref<85xf32, #tpu.memory_space<smem>>
    %228 = vector.broadcast %227 : f32 to vector<1x128xf32>
    %229 = arith.mulf %50, %228 : vector<1x128xf32>
    %230 = arith.addf %226, %229 : vector<1x128xf32>
    %c56 = arith.constant 56 : index
    %231 = memref.load %arg1[%c56] : memref<85xf32, #tpu.memory_space<smem>>
    %232 = vector.broadcast %231 : f32 to vector<1x128xf32>
    %233 = arith.mulf %73, %232 : vector<1x128xf32>
    %234 = arith.addf %230, %233 : vector<1x128xf32>
    %c57 = arith.constant 57 : index
    %235 = memref.load %arg1[%c57] : memref<85xf32, #tpu.memory_space<smem>>
    %236 = vector.broadcast %235 : f32 to vector<1x128xf32>
    %237 = arith.mulf %96, %236 : vector<1x128xf32>
    %238 = arith.addf %234, %237 : vector<1x128xf32>
    %c58 = arith.constant 58 : index
    %239 = memref.load %arg1[%c58] : memref<85xf32, #tpu.memory_space<smem>>
    %240 = vector.broadcast %239 : f32 to vector<1x128xf32>
    %241 = arith.mulf %119, %240 : vector<1x128xf32>
    %242 = arith.addf %238, %241 : vector<1x128xf32>
    %c59 = arith.constant 59 : index
    %243 = memref.load %arg1[%c59] : memref<85xf32, #tpu.memory_space<smem>>
    %244 = vector.broadcast %243 : f32 to vector<1x128xf32>
    %245 = arith.mulf %142, %244 : vector<1x128xf32>
    %246 = arith.addf %242, %245 : vector<1x128xf32>
    %c75 = arith.constant 75 : index
    %247 = memref.load %arg1[%c75] : memref<85xf32, #tpu.memory_space<smem>>
    %248 = vector.broadcast %247 : f32 to vector<1x128xf32>
    %249 = arith.addf %246, %248 : vector<1x128xf32>
    %250 = math.tanh %249 : vector<1x128xf32>
    %c60 = arith.constant 60 : index
    %251 = memref.load %arg1[%c60] : memref<85xf32, #tpu.memory_space<smem>>
    %252 = vector.broadcast %251 : f32 to vector<1x128xf32>
    %253 = arith.mulf %27, %252 : vector<1x128xf32>
    %c61 = arith.constant 61 : index
    %254 = memref.load %arg1[%c61] : memref<85xf32, #tpu.memory_space<smem>>
    %255 = vector.broadcast %254 : f32 to vector<1x128xf32>
    %256 = arith.mulf %50, %255 : vector<1x128xf32>
    %257 = arith.addf %253, %256 : vector<1x128xf32>
    %c62 = arith.constant 62 : index
    %258 = memref.load %arg1[%c62] : memref<85xf32, #tpu.memory_space<smem>>
    %259 = vector.broadcast %258 : f32 to vector<1x128xf32>
    %260 = arith.mulf %73, %259 : vector<1x128xf32>
    %261 = arith.addf %257, %260 : vector<1x128xf32>
    %c63 = arith.constant 63 : index
    %262 = memref.load %arg1[%c63] : memref<85xf32, #tpu.memory_space<smem>>
    %263 = vector.broadcast %262 : f32 to vector<1x128xf32>
    %264 = arith.mulf %96, %263 : vector<1x128xf32>
    %265 = arith.addf %261, %264 : vector<1x128xf32>
    %c64 = arith.constant 64 : index
    %266 = memref.load %arg1[%c64] : memref<85xf32, #tpu.memory_space<smem>>
    %267 = vector.broadcast %266 : f32 to vector<1x128xf32>
    %268 = arith.mulf %119, %267 : vector<1x128xf32>
    %269 = arith.addf %265, %268 : vector<1x128xf32>
    %c65 = arith.constant 65 : index
    %270 = memref.load %arg1[%c65] : memref<85xf32, #tpu.memory_space<smem>>
    %271 = vector.broadcast %270 : f32 to vector<1x128xf32>
    %272 = arith.mulf %142, %271 : vector<1x128xf32>
    %273 = arith.addf %269, %272 : vector<1x128xf32>
    %c76 = arith.constant 76 : index
    %274 = memref.load %arg1[%c76] : memref<85xf32, #tpu.memory_space<smem>>
    %275 = vector.broadcast %274 : f32 to vector<1x128xf32>
    %276 = arith.addf %273, %275 : vector<1x128xf32>
    %277 = math.tanh %276 : vector<1x128xf32>
    %c66 = arith.constant 66 : index
    %278 = memref.load %arg1[%c66] : memref<85xf32, #tpu.memory_space<smem>>
    %279 = vector.broadcast %278 : f32 to vector<1x128xf32>
    %280 = arith.mulf %27, %279 : vector<1x128xf32>
    %c67 = arith.constant 67 : index
    %281 = memref.load %arg1[%c67] : memref<85xf32, #tpu.memory_space<smem>>
    %282 = vector.broadcast %281 : f32 to vector<1x128xf32>
    %283 = arith.mulf %50, %282 : vector<1x128xf32>
    %284 = arith.addf %280, %283 : vector<1x128xf32>
    %c68 = arith.constant 68 : index
    %285 = memref.load %arg1[%c68] : memref<85xf32, #tpu.memory_space<smem>>
    %286 = vector.broadcast %285 : f32 to vector<1x128xf32>
    %287 = arith.mulf %73, %286 : vector<1x128xf32>
    %288 = arith.addf %284, %287 : vector<1x128xf32>
    %c69 = arith.constant 69 : index
    %289 = memref.load %arg1[%c69] : memref<85xf32, #tpu.memory_space<smem>>
    %290 = vector.broadcast %289 : f32 to vector<1x128xf32>
    %291 = arith.mulf %96, %290 : vector<1x128xf32>
    %292 = arith.addf %288, %291 : vector<1x128xf32>
    %c70 = arith.constant 70 : index
    %293 = memref.load %arg1[%c70] : memref<85xf32, #tpu.memory_space<smem>>
    %294 = vector.broadcast %293 : f32 to vector<1x128xf32>
    %295 = arith.mulf %119, %294 : vector<1x128xf32>
    %296 = arith.addf %292, %295 : vector<1x128xf32>
    %c71 = arith.constant 71 : index
    %297 = memref.load %arg1[%c71] : memref<85xf32, #tpu.memory_space<smem>>
    %298 = vector.broadcast %297 : f32 to vector<1x128xf32>
    %299 = arith.mulf %142, %298 : vector<1x128xf32>
    %300 = arith.addf %296, %299 : vector<1x128xf32>
    %c77 = arith.constant 77 : index
    %301 = memref.load %arg1[%c77] : memref<85xf32, #tpu.memory_space<smem>>
    %302 = vector.broadcast %301 : f32 to vector<1x128xf32>
    %303 = arith.addf %300, %302 : vector<1x128xf32>
    %304 = math.tanh %303 : vector<1x128xf32>
    %c78 = arith.constant 78 : index
    %305 = memref.load %arg1[%c78] : memref<85xf32, #tpu.memory_space<smem>>
    %306 = vector.broadcast %305 : f32 to vector<1x128xf32>
    %307 = arith.mulf %169, %306 : vector<1x128xf32>
    %c79 = arith.constant 79 : index
    %308 = memref.load %arg1[%c79] : memref<85xf32, #tpu.memory_space<smem>>
    %309 = vector.broadcast %308 : f32 to vector<1x128xf32>
    %310 = arith.mulf %196, %309 : vector<1x128xf32>
    %311 = arith.addf %307, %310 : vector<1x128xf32>
    %c80 = arith.constant 80 : index
    %312 = memref.load %arg1[%c80] : memref<85xf32, #tpu.memory_space<smem>>
    %313 = vector.broadcast %312 : f32 to vector<1x128xf32>
    %314 = arith.mulf %223, %313 : vector<1x128xf32>
    %315 = arith.addf %311, %314 : vector<1x128xf32>
    %c81 = arith.constant 81 : index
    %316 = memref.load %arg1[%c81] : memref<85xf32, #tpu.memory_space<smem>>
    %317 = vector.broadcast %316 : f32 to vector<1x128xf32>
    %318 = arith.mulf %250, %317 : vector<1x128xf32>
    %319 = arith.addf %315, %318 : vector<1x128xf32>
    %c82 = arith.constant 82 : index
    %320 = memref.load %arg1[%c82] : memref<85xf32, #tpu.memory_space<smem>>
    %321 = vector.broadcast %320 : f32 to vector<1x128xf32>
    %322 = arith.mulf %277, %321 : vector<1x128xf32>
    %323 = arith.addf %319, %322 : vector<1x128xf32>
    %c83 = arith.constant 83 : index
    %324 = memref.load %arg1[%c83] : memref<85xf32, #tpu.memory_space<smem>>
    %325 = vector.broadcast %324 : f32 to vector<1x128xf32>
    %326 = arith.mulf %304, %325 : vector<1x128xf32>
    %327 = arith.addf %323, %326 : vector<1x128xf32>
    %c84 = arith.constant 84 : index
    %328 = memref.load %arg1[%c84] : memref<85xf32, #tpu.memory_space<smem>>
    %329 = vector.broadcast %328 : f32 to vector<1x128xf32>
    %330 = arith.addf %327, %329 : vector<1x128xf32>
    %331 = arith.negf %330 : vector<1x128xf32>
    %332 = math.exp %331 : vector<1x128xf32>
    %cst = arith.constant 1.000000e+00 : f32
    %333 = vector.broadcast %cst : f32 to vector<1x128xf32>
    %334 = arith.addf %333, %332 : vector<1x128xf32>
    %335 = arith.divf %333, %334 : vector<1x128xf32>
    %cst_10 = arith.constant 1.000000e+03 : f32
    %336 = vector.broadcast %cst_10 : f32 to vector<1x128xf32>
    %337 = arith.mulf %335, %336 : vector<1x128xf32>
    %c0_11 = arith.constant 0 : index
    %c0_12 = arith.constant 0 : index
    %338 = vector.load %arg3[%c0_11, %c0_12] : memref<1x128xf32, #tpu.memory_space<vmem>>, vector<1x128xf32>
    tpu.vector_store %arg3[%c0_11, %c0_12], %337 {strides = array<i32>} : memref<1x128xf32, #tpu.memory_space<vmem>>, vector<1x128xf32>,
    return
  }
  func.func @transform_0(%arg0: i32) -> i32 {
    %c0_i32 = arith.constant 0 : i32
    %c0_i32_0 = arith.constant 0 : i32
    return %c0_i32 : i32
  }
  func.func @transform_1(%arg0: i32) -> (i32, i32) {
    %c0_i32 = arith.constant 0 : i32
    %c0_i32_0 = arith.constant 0 : i32
    return %c0_i32, %arg0 : i32, i32
  }
  func.func @transform_2(%arg0: i32) -> (i32, i32) {
    %c0_i32 = arith.constant 0 : i32
    %c0_i32_0 = arith.constant 0 : i32
    return %c0_i32, %arg0 : i32, i32
  }
}

</mosaic_0001>

<bundles_post_ra>
// kernel: controller_forward.1
= control target key start
LH: loop header
LB: loop body
LE: loop exit
PB: predicated region body
PF: predicated region fallthrough
CT: control target
= control target key end

     0   :  { %7 = vsyncpa [#allocation3], 0  ;;  %s714_s0 = inlined_call_operand.vmem [shape: f32[85], index: 0, kind: input, shape index: {}]   ;;  %s715_s1 = inlined_call_operand.vmem [shape: f32[5,128], index: 1, kind: input, shape index: {}]   ;;  %s716_s2 = inlined_call_operand.vmem [shape: f32[1,128], index: 2, kind: output, shape index: {}]  }
   0x1   :  { %s14_s11 = sshll.u32 %s714_s0, 4  ;;  %s15_s11 = int_to_ptr.vmem [resolvable:$true] %s14_s11 }
   0x2   :  { %s482_s12 = scalar_lea.vmem %s15_s11, 16  ;;  %p487_p1 = scmp.lt.s32.totalorder %s15_s11, %s15_s11 }
   0x3   :  { %p483_p0 = scmp.ne.s32.totalorder %s15_s11, %s482_s12  ;;  %p488_p2 = scmp.lt.s32.totalorder %s482_s12, %s482_s12 }
   0x5   :  { %p489_p3 = por %p488_p2, %p487_p1 }
   0x7   :  { %p490_p4 = pnand %p489_p3, %p483_p0 }
   0x9   :  { %493 = shalt.err (!%p490_p4)
}
   0xa   :  { %s496_s13 = smov [#allocation2]  }
   0xb   :  { %17 = dma.vmem_to_smem %s15_s11, 16, %s496_s13, [#allocation3]  }
   0xc   :  { %494 = dma.done.wait [#allocation3], 16  }
   0xd   :  { %495 = vsyncadd [#allocation3], 4294967280 }
   0xe   :  { %23 = sfence }
   0xf   :  { %s29_s14 = sld [smem:[#allocation2]]  ;;  %v518_v0 = vld [vmem:[%s715_s1] sm:$0x1]  ;;  %v525_v1 = vld [vmem:[%s715_s1 + $0x1] sm:$0x1] }
  0x10   :  { %s368_s15 = sld [smem:[#allocation2 + $0x1]]  ;;  %v532_v2 = vld [vmem:[%s715_s1 + $0x2] sm:$0x1]  ;;  %v538_v6 = vld [vmem:[%s715_s1 + $0x3] sm:$0x1] }
  0x11   :  { %s369_s16 = sld [smem:[#allocation2 + $0x2]]  ;;  %v548_v13 = vld [vmem:[%s715_s1 + $0x4] sm:$0x1] }
  0x12   :  { %s370_s17 = sld [smem:[#allocation2 + $0x3]] }
  0x13   :  { %s520_s0 = sld [smem:[#allocation2 + $0x4]] }
  0x14   :  { %s527_s22 = sld [smem:[#allocation2 + $0x1e]] }
  0x15   :  { %v30_v3 = vstv %s29_s14  ;;  %s373_s25 = sld [smem:[#allocation2 + $0x5]] }
  0x16   :  { %v31_v4 = vmul.f32 %v30_v3, %v518_v0  ;;  %v33_v5 = vstv %s368_s15  ;;  %s374_s26 = sld [smem:[#allocation2 + $0x6]] }
  0x17   :  { %v34_v7 = vmul.f32 %v33_v5, %v525_v1  ;;  %v37_v8 = vstv %s369_s16  ;;  %s375_s29 = sld [smem:[#allocation2 + $0x7]] }
  0x18   :  { %v38_v9 = vmul.f32 %v37_v8, %v532_v2  ;;  %v41_v10 = vstv %s370_s17  ;;  %s376_s30 = sld [smem:[#allocation2 + $0x8]] }
  0x19   :  { %v35_v11 = vadd.f32 %v34_v7, %v31_v4  ;;  %s377_s3 = sld [smem:[#allocation2 + $0x9]]  ;;  %v42_v12 = vmul.f32 %v41_v10, %v538_v6  ;;  %v45_v15 = vstv %s520_s0 }
  0x1a   :  { %s543_s4 = sld [smem:[#allocation2 + $0x1f]]  ;;  %v46_v22 = vmul.f32 %v45_v15, %v548_v13  ;;  %v49_v34 = vstv %s527_s22 }
  0x1b   :  { %v39_v14 = vadd.f32 %v38_v9, %v35_v11  ;;  %v53_v16 = vstv %s373_s25  ;;  %s379_s7 = sld [smem:[#allocation2 + $0xa]] }
  0x1c   :  { %v54_v17 = vmul.f32 %v53_v16, %v518_v0  ;;  %v56_v18 = vstv %s374_s26  ;;  %s380_s8 = sld [smem:[#allocation2 + $0xb]] }
  0x1d   :  { %v57_v19 = vmul.f32 %v56_v18, %v525_v1  ;;  %v60_v20 = vstv %s375_s29  ;;  %s381_s9 = sld [smem:[#allocation2 + $0xc]]  ;;  %v43_v21 = vadd.f32 %v42_v12, %v39_v14 }
  0x1e   :  { %v61_v23 = vmul.f32 %v60_v20, %v532_v2  ;;  %v64_v24 = vstv %s376_s30  ;;  %s382_s1 = sld [smem:[#allocation2 + $0xd]] }
  0x1f   :  { %v58_v25 = vadd.f32 %v57_v19, %v54_v17  ;;  %v65_v26 = vmul.f32 %v64_v24, %v538_v6  ;;  %v68_v27 = vstv %s377_s3  ;;  %s383_s10 = sld [smem:[#allocation2 + $0xe]]  ;;  %v47_v31 = vadd.f32 %v46_v22, %v43_v21 }
  0x20   :  { %s556_s11 = sld [smem:[#allocation2 + $0x20]]  ;;  %v69_v29 = vmul.f32 %v68_v27, %v548_v13  ;;  %v72_v38 = vstv %s543_s4 }
  0x21   :  { %v62_v28 = vadd.f32 %v61_v23, %v58_v25  ;;  %v76_v30 = vstv %s379_s7  ;;  %s385_s12 = sld [smem:[#allocation2 + $0xf]]  ;;  %v50_v45 = vadd.f32 %v49_v34, %v47_v31 }
  0x22   :  { %v77_v32 = vmul.f32 %v76_v30, %v518_v0  ;;  %v79_v33 = vstv %s380_s8  ;;  %s386_s13 = sld [smem:[#allocation2 + $0x10]] }
  0x23   :  { %v66_v35 = vadd.f32 %v65_v26, %v62_v28  ;;  %v80_v36 = vmul.f32 %v79_v33, %v525_v1  ;;  %v83_v37 = vstv %s381_s9  ;;  %s387_s14 = sld [smem:[#allocation2 + $0x11]]  ;;  %454 = vtanh.f32 %v50_v45 }
  0x24   :  { %v84_v39 = vmul.f32 %v83_v37, %v532_v2  ;;  %v87_v40 = vstv %s382_s1  ;;  %s388_s15 = sld [smem:[#allocation2 + $0x12]] }
  0x25   :  { %v70_v41 = vadd.f32 %v69_v29, %v66_v35  ;;  %v81_v42 = vadd.f32 %v80_v36, %v77_v32  ;;  %v88_v43 = vmul.f32 %v87_v40, %v538_v6  ;;  %v91_v44 = vstv %s383_s10  ;;  %s389_s16 = sld [smem:[#allocation2 + $0x13]] }
  0x26   :  { %s565_s17 = sld [smem:[#allocation2 + $0x21]]  ;;  %v92_v47 = vmul.f32 %v91_v44, %v548_v13  ;;  %v95_v55 = vstv %s556_s11 }
  0x27   :  { %v85_v46 = vadd.f32 %v84_v39, %v81_v42  ;;  %v99_v48 = vstv %s385_s12  ;;  %s391_s18 = sld [smem:[#allocation2 + $0x14]]  ;;  %v73_v49 = vadd.f32 %v72_v38, %v70_v41 }
  0x28   :  { %v100_v50 = vmul.f32 %v99_v48, %v518_v0  ;;  %v102_v51 = vstv %s386_s13  ;;  %s392_s19 = sld [smem:[#allocation2 + $0x15]] }
  0x29   :  { %v89_v52 = vadd.f32 %v88_v43, %v85_v46  ;;  %v103_v53 = vmul.f32 %v102_v51, %v525_v1  ;;  %v106_v54 = vstv %s387_s14  ;;  %s393_s0 = sld [smem:[#allocation2 + $0x16]]  ;;  %456 = vtanh.f32 %v73_v49 }
  0x2a   :  { %v107_v56 = vmul.f32 %v106_v54, %v532_v2  ;;  %v110_v57 = vstv %s388_s15  ;;  %s394_s20 = sld [smem:[#allocation2 + $0x17]] }
  0x2b   :  { %v93_v58 = vadd.f32 %v92_v47, %v89_v52  ;;  %v104_v59 = vadd.f32 %v103_v53, %v100_v50  ;;  %v111_v60 = vmul.f32 %v110_v57, %v538_v6  ;;  %v114_v61 = vstv %s389_s16  ;;  %s395_s21 = sld [smem:[#allocation2 + $0x18]] }
  0x2c   :  { %s573_s22 = sld [smem:[#allocation2 + $0x22]]  ;;  %v115_v3 = vmul.f32 %v114_v61, %v548_v13  ;;  %v118_v11 = vstv %s565_s17 }
  0x2d   :  { %v96_v62 = vadd.f32 %v95_v55, %v93_v58  ;;  %v108_v63 = vadd.f32 %v107_v56, %v104_v59  ;;  %v122_v4 = vstv %s391_s18  ;;  %s397_s23 = sld [smem:[#allocation2 + $0x19]] }
  0x2e   :  { %v123_v5 = vmul.f32 %v122_v4, %v518_v0  ;;  %v125_v7 = vstv %s392_s19  ;;  %s398_s24 = sld [smem:[#allocation2 + $0x1a]] }
  0x2f   :  { %v112_v8 = vadd.f32 %v111_v60, %v108_v63  ;;  %v126_v9 = vmul.f32 %v125_v7, %v525_v1  ;;  %v129_v10 = vstv %s393_s0  ;;  %s399_s25 = sld [smem:[#allocation2 + $0x1b]]  ;;  %458 = vtanh.f32 %v96_v62 }
  0x30   :  { %v130_v12 = vmul.f32 %v129_v10, %v532_v2  ;;  %v133_v14 = vstv %s394_s20  ;;  %s400_s26 = sld [smem:[#allocation2 + $0x1c]]  ;;  %v594_v31 = vpop.eup %454 }
  0x31   :  { %v116_v15 = vadd.f32 %v115_v3, %v112_v8  ;;  %v127_v16 = vadd.f32 %v126_v9, %v123_v5  ;;  %v134_v17 = vmul.f32 %v133_v14, %v538_v6  ;;  %v137_v18 = vstv %s395_s21  ;;  %s401_s27 = sld [smem:[#allocation2 + $0x1d]] }
  0x32   :  { %s581_s28 = sld [smem:[#allocation2 + $0x23]]  ;;  %v138_v21 = vmul.f32 %v137_v18, %v548_v13  ;;  %v141_v28 = vstv %s573_s22 }
  0x33   :  { %v119_v19 = vadd.f32 %v118_v11, %v116_v15  ;;  %v131_v20 = vadd.f32 %v130_v12, %v127_v16  ;;  %v145_v22 = vstv %s397_s23  ;;  %s584_s29 = sld [smem:[#allocation2 + $0x24]] }
  0x34   :  { %v146_v23 = vmul.f32 %v145_v22, %v518_v0  ;;  %v148_v24 = vstv %s398_s24  ;;  %s404_s30 = sld [smem:[#allocation2 + $0x25]] }
  0x35   :  { %460 = vtanh.f32 %v119_v19  ;;  %v135_v25 = vadd.f32 %v134_v17, %v131_v20  ;;  %v149_v26 = vmul.f32 %v148_v24, %v525_v1  ;;  %v152_v27 = vstv %s399_s25  ;;  %s588_s3 = sld [smem:[#allocation2 + $0x26]] }
  0x36   :  { %v153_v29 = vmul.f32 %v152_v27, %v532_v2  ;;  %v156_v30 = vstv %s400_s26  ;;  %s592_s4 = sld [smem:[#allocation2 + $0x27]]  ;;  %v601_v1 = vpop.eup %456 }
  0x37   :  { %v139_v32 = vadd.f32 %v138_v21, %v135_v25  ;;  %v150_v0 = vadd.f32 %v149_v26, %v146_v23  ;;  %v157_v33 = vmul.f32 %v156_v30, %v538_v6  ;;  %v160_v34 = vstv %s401_s27  ;;  %s597_s5 = sld [smem:[#allocation2 + $0x28]] }
  0x38   :  { %s599_s6 = sld [smem:[#allocation2 + $0x29]]  ;;  %v161_v36 = vmul.f32 %v160_v34, %v548_v13  ;;  %v164_v6 = vstv %s581_s28 }
  0x39   :  { %v142_v35 = vadd.f32 %v141_v28, %v139_v32  ;;  %v154_v2 = vadd.f32 %v153_v29, %v150_v0  ;;  %v168_v37 = vstv %s584_s29  ;;  %s605_s7 = sld [smem:[#allocation2 + $0x48]] }
  0x3a   :  { %v171_v38 = vstv %s404_s30  ;;  %s410_s8 = sld [smem:[#allocation2 + $0x2a]]  ;;  %v169_v40 = vmul.f32 %v594_v31, %v168_v37 }
  0x3b   :  { %462 = vtanh.f32 %v142_v35  ;;  %v158_v39 = vadd.f32 %v157_v33, %v154_v2  ;;  %s411_s9 = sld [smem:[#allocation2 + $0x2b]]  ;;  %v172_v41 = vmul.f32 %v601_v1, %v171_v38  ;;  %v175_v44 = vstv %s588_s3 }
  0x3c   :  { %s412_s1 = sld [smem:[#allocation2 + $0x2c]]  ;;  %v610_v42 = vpop.eup %458  ;;  %v179_v48 = vstv %s592_s4 }
  0x3d   :  { %v162_v43 = vadd.f32 %v161_v36, %v158_v39  ;;  %s413_s10 = sld [smem:[#allocation2 + $0x2d]]  ;;  %v173_v45 = vadd.f32 %v172_v41, %v169_v40  ;;  %v176_v46 = vmul.f32 %v610_v42, %v175_v44  ;;  %v183_v60 = vstv %s597_s5 }
  0x3e   :  { %s613_s11 = sld [smem:[#allocation2 + $0x2e]]  ;;  %v187_v19 = vstv %s599_s6 }
  0x3f   :  { %v165_v13 = vadd.f32 %v164_v6, %v162_v43  ;;  %s615_s12 = sld [smem:[#allocation2 + $0x2f]]  ;;  %v177_v56 = vadd.f32 %v176_v46, %v173_v45  ;;  %v191_v27 = vstv %s605_s7 }
  0x40   :  { %v195_v47 = vstv %s410_s8  ;;  %s618_s13 = sld [smem:[#allocation2 + $0x49]] }
  0x41   :  { %464 = vtanh.f32 %v165_v13  ;;  %v196_v49 = vmul.f32 %v594_v31, %v195_v47  ;;  %v198_v50 = vstv %s411_s9  ;;  %s417_s14 = sld [smem:[#allocation2 + $0x30]] }
  0x42   :  { %v622_v51 = vpop.eup %460  ;;  %v199_v52 = vmul.f32 %v601_v1, %v198_v50  ;;  %v202_v53 = vstv %s412_s1  ;;  %s418_s15 = sld [smem:[#allocation2 + $0x31]] }
  0x43   :  { %v203_v54 = vmul.f32 %v610_v42, %v202_v53  ;;  %v206_v55 = vstv %s413_s10  ;;  %s419_s16 = sld [smem:[#allocation2 + $0x32]]  ;;  %v180_v57 = vmul.f32 %v622_v51, %v179_v48 }
  0x44   :  { %v200_v58 = vadd.f32 %v199_v52, %v196_v49  ;;  %v207_v59 = vmul.f32 %v622_v51, %v206_v55  ;;  %s420_s17 = sld [smem:[#allocation2 + $0x33]]  ;;  %v210_v62 = vstv %s613_s11 }
  0x45   :  { %s628_s18 = sld [smem:[#allocation2 + $0x34]]  ;;  %v181_v4 = vadd.f32 %v180_v57, %v177_v56  ;;  %v214_v20 = vstv %s615_s12 }
  0x46   :  { %v204_v61 = vadd.f32 %v203_v54, %v200_v58  ;;  %s632_s19 = sld [smem:[#allocation2 + $0x35]]  ;;  %v218_v32 = vstv %s618_s13 }
  0x47   :  { %v222_v63 = vstv %s417_s14  ;;  %s634_s0 = sld [smem:[#allocation2 + $0x4a]] }
  0x48   :  { %v636_v3 = vpop.eup %462  ;;  %v208_v5 = vadd.f32 %v207_v59, %v204_v61  ;;  %v223_v7 = vmul.f32 %v594_v31, %v222_v63  ;;  %v225_v8 = vstv %s418_s15  ;;  %s639_s20 = sld [smem:[#allocation2 + $0x36]] }
  0x49   :  { %v184_v9 = vmul.f32 %v636_v3, %v183_v60  ;;  %v211_v10 = vmul.f32 %v636_v3, %v210_v62  ;;  %v226_v11 = vmul.f32 %v601_v1, %v225_v8  ;;  %v229_v12 = vstv %s419_s16  ;;  %s644_s21 = sld [smem:[#allocation2 + $0x37]] }
  0x4a   :  { %v230_v14 = vmul.f32 %v610_v42, %v229_v12  ;;  %v233_v15 = vstv %s420_s17  ;;  %s647_s22 = sld [smem:[#allocation2 + $0x38]] }
  0x4b   :  { %v227_v16 = vadd.f32 %v226_v11, %v223_v7  ;;  %v234_v17 = vmul.f32 %v622_v51, %v233_v15  ;;  %s650_s23 = sld [smem:[#allocation2 + $0x39]]  ;;  %v185_v18 = vadd.f32 %v184_v9, %v181_v4  ;;  %v237_v21 = vstv %s628_s18 }
  0x4c   :  { %s655_s24 = sld [smem:[#allocation2 + $0x3a]]  ;;  %v212_v22 = vadd.f32 %v211_v10, %v208_v5  ;;  %v238_v24 = vmul.f32 %v636_v3, %v237_v21  ;;  %v241_v25 = vstv %s632_s19 }
  0x4d   :  { %v231_v23 = vadd.f32 %v230_v14, %v227_v16  ;;  %s659_s25 = sld [smem:[#allocation2 + $0x3b]]  ;;  %v245_v48 = vstv %s634_s0 }
  0x4e   :  { %v661_v26 = vpop.eup %464  ;;  %v249_v28 = vstv %s639_s20  ;;  %s665_s26 = sld [smem:[#allocation2 + $0x4b]] }
  0x4f   :  { %v188_v29 = vmul.f32 %v661_v26, %v187_v19  ;;  %v215_v30 = vmul.f32 %v661_v26, %v214_v20  ;;  %v235_v0 = vadd.f32 %v234_v17, %v231_v23  ;;  %s670_s27 = sld [smem:[#allocation2 + $0x3c]]  ;;  %v242_v33 = vmul.f32 %v661_v26, %v241_v25 }
  0x50   :  { %v250_v34 = vmul.f32 %v594_v31, %v249_v28  ;;  %v252_v35 = vstv %s644_s21  ;;  %v256_v2 = vstv %s647_s22  ;;  %s432_s28 = sld [smem:[#allocation2 + $0x3d]] }
  0x51   :  { %v189_v36 = vadd.f32 %v188_v29, %v185_v18  ;;  %v216_v37 = vadd.f32 %v215_v30, %v212_v22  ;;  %v239_v38 = vadd.f32 %v238_v24, %v235_v0  ;;  %v253_v39 = vmul.f32 %v601_v1, %v252_v35  ;;  %s677_s29 = sld [smem:[#allocation2 + $0x3e]] }
  0x52   :  { %v257_v6 = vmul.f32 %v610_v42, %v256_v2  ;;  %v260_v40 = vstv %s650_s23  ;;  %v264_v41 = vstv %s655_s24  ;;  %s434_s30 = sld [smem:[#allocation2 + $0x3f]] }
  0x53   :  { %v192_v43 = vadd.f32 %v191_v27, %v189_v36  ;;  %v254_v44 = vadd.f32 %v253_v39, %v250_v34  ;;  %s682_s3 = sld [smem:[#allocation2 + $0x40]]  ;;  %v219_v13 = vadd.f32 %v218_v32, %v216_v37  ;;  %v243_v45 = vadd.f32 %v242_v33, %v239_v38 }
  0x54   :  { %v261_v46 = vmul.f32 %v622_v51, %v260_v40  ;;  %v268_v47 = vstv %s659_s25  ;;  %s686_s4 = sld [smem:[#allocation2 + $0x41]]  ;;  %v265_v50 = vmul.f32 %v636_v3, %v264_v41  ;;  %v272_v5 = vstv %s665_s26 }
  0x55   :  { %v258_v49 = vadd.f32 %v257_v6, %v254_v44  ;;  %s690_s5 = sld [smem:[#allocation2 + $0x4c]]  ;;  %466 = vtanh.f32 %v192_v43  ;;  %v276_v52 = vstv %s670_s27  ;;  %v269_v55 = vmul.f32 %v661_v26, %v268_v47 }
  0x56   :  { %v279_v53 = vstv %s432_s28  ;;  %s438_s6 = sld [smem:[#allocation2 + $0x42]]  ;;  %v277_v56 = vmul.f32 %v594_v31, %v276_v52  ;;  %468 = vtanh.f32 %v219_v13  ;;  %v246_v58 = vadd.f32 %v245_v48, %v243_v45 }
  0x57   :  { %v262_v54 = vadd.f32 %v261_v46, %v258_v49  ;;  %v280_v57 = vmul.f32 %v601_v1, %v279_v53  ;;  %s439_s7 = sld [smem:[#allocation2 + $0x43]]  ;;  %v283_v59 = vstv %s677_s29 }
  0x58   :  { %v287_v60 = vstv %s434_s30  ;;  %s440_s8 = sld [smem:[#allocation2 + $0x44]]  ;;  %v284_v63 = vmul.f32 %v610_v42, %v283_v59  ;;  %470 = vtanh.f32 %v246_v58 }
  0x59   :  { %v266_v61 = vadd.f32 %v265_v50, %v262_v54  ;;  %v281_v62 = vadd.f32 %v280_v57, %v277_v56  ;;  %v288_v4 = vmul.f32 %v622_v51, %v287_v60  ;;  %s441_s9 = sld [smem:[#allocation2 + $0x45]]  ;;  %v291_v7 = vstv %s682_s3 }
  0x5a   :  { %v295_v8 = vstv %s686_s4  ;;  %s442_s1 = sld [smem:[#allocation2 + $0x46]]  ;;  %v292_v11 = vmul.f32 %v636_v3, %v291_v7 }
  0x5b   :  { %v270_v9 = vadd.f32 %v269_v55, %v266_v61  ;;  %v285_v10 = vadd.f32 %v284_v63, %v281_v62  ;;  %s443_s10 = sld [smem:[#allocation2 + $0x47]]  ;;  %v296_v12 = vmul.f32 %v661_v26, %v295_v8  ;;  %v299_v22 = vstv %s690_s5 }
  0x5c   :  { %v303_v14 = vstv %s438_s6  ;;  %s445_s11 = sld [smem:[#allocation2 + $0x4e]] }
  0x5d   :  { %v273_v15 = vadd.f32 %v272_v5, %v270_v9  ;;  %v289_v16 = vadd.f32 %v288_v4, %v285_v10  ;;  %v304_v17 = vmul.f32 %v594_v31, %v303_v14  ;;  %v306_v18 = vstv %s439_s7  ;;  %s446_s12 = sld [smem:[#allocation2 + $0x4f]] }
  0x5e   :  { %v307_v19 = vmul.f32 %v601_v1, %v306_v18  ;;  %v310_v20 = vstv %s440_s8  ;;  %s444_s13 = sld [smem:[#allocation2 + $0x4d]] }
  0x5f   :  { %v293_v21 = vadd.f32 %v292_v11, %v289_v16  ;;  %v311_v23 = vmul.f32 %v610_v42, %v310_v20  ;;  %v314_v24 = vstv %s441_s9  ;;  %472 = vtanh.f32 %v273_v15  ;;  %s447_s14 = sld [smem:[#allocation2 + $0x50]] }
  0x60   :  { %v308_v25 = vadd.f32 %v307_v19, %v304_v17  ;;  %v315_v27 = vmul.f32 %v622_v51, %v314_v24  ;;  %v318_v28 = vstv %s442_s1  ;;  %s448_s15 = sld [smem:[#allocation2 + $0x51]] }
  0x61   :  { %v297_v29 = vadd.f32 %v296_v12, %v293_v21  ;;  %v322_v30 = vstv %s443_s10  ;;  %v319_v32 = vmul.f32 %v636_v3, %v318_v28  ;;  %s449_s16 = sld [smem:[#allocation2 + $0x52]] }
  0x62   :  { %v312_v31 = vadd.f32 %v311_v23, %v308_v25  ;;  %v467_v1 = vpop.eup %466  ;;  %v323_v34 = vmul.f32 %v661_v26, %v322_v30  ;;  %v330_v42 = vstv %s445_s11  ;;  %s450_s17 = sld [smem:[#allocation2 + $0x53]] }
  0x63   :  { %v300_v0 = vadd.f32 %v299_v22, %v297_v29  ;;  %v469_v35 = vpop.eup %468  ;;  %v333_v2 = vstv %s446_s12  ;;  %v331_v38 = vmul.f32 %v467_v1, %v330_v42  ;;  %s451_s18 = sld [smem:[#allocation2 + $0x54]] }
  0x64   :  { %v316_v33 = vadd.f32 %v315_v27, %v312_v31  ;;  %v326_v37 = vstv %s444_s13  ;;  %v334_v39 = vmul.f32 %v469_v35, %v333_v2 }
  0x65   :  { %474 = vtanh.f32 %v300_v0  ;;  %v471_v6 = vpop.eup %470  ;;  %v337_v40 = vstv %s447_s14 }
  0x66   :  { %v320_v36 = vadd.f32 %v319_v32, %v316_v33  ;;  %v335_v3 = vadd.f32 %v334_v39, %v331_v38  ;;  %v338_v43 = vmul.f32 %v471_v6, %v337_v40  ;;  %v341_v13 = vstv %s448_s15 }
  0x67   :  { %v345_v46 = vstv %s449_s16 }
  0x68   :  { %v324_v51 = vadd.f32 %v323_v34, %v320_v36  ;;  %v339_v26 = vadd.f32 %v338_v43, %v335_v3  ;;  %v349_v50 = vstv %s450_s17 }
  0x69   :  { %v353_v55 = vstv %s451_s18 }
  0x6a   :  { %v327_v41 = vadd.f32 %v326_v37, %v324_v51 }
  0x6c   :  { %476 = vtanh.f32 %v327_v41  ;;  %v473_v44 = vpop.eup %472 }
  0x6d   :  { %v342_v45 = vmul.f32 %v473_v44, %v341_v13 }
  0x6f   :  { %v343_v48 = vadd.f32 %v342_v45, %v339_v26 }
  0x72   :  { %v475_v47 = vpop.eup %474 }
  0x73   :  { %v346_v49 = vmul.f32 %v475_v47, %v345_v46 }
  0x75   :  { %v347_v52 = vadd.f32 %v346_v49, %v343_v48 }
  0x79   :  { %v477_v53 = vpop.eup %476 }
  0x7a   :  { %v350_v54 = vmul.f32 %v477_v53, %v349_v50 }
  0x7c   :  { %v351_v56 = vadd.f32 %v350_v54, %v347_v52 }
  0x7e   :  { %v354_v57 = vadd.f32 %v353_v55, %v351_v56 }
  0x80   :  { %v452_v58 = vmul.f32 -1.442695, %v354_v57 }
  0x82   :  { %478 = vpow2.f32 %v452_v58 }
  0x8f   :  { %v479_v59 = vpop.eup %478 }
  0x90   :  { %v358_v60 = vadd.f32 1.0, %v479_v59 }
  0x92   :  { %480 = vrcp.f32 %v358_v60 }
  0x9f   :  { %v481_v61 = vpop.eup %480 }
  0xa0   :  { %v361_v62 = vmul.f32 1000.0, %v481_v61 }
  0xa2   :  { %362 = vst [vmem:[%s716_s2] sm:$0x1] %v361_v62 }
  0xa3   :  { %367 = vsyncpa [#allocation3], 1 }

</bundles_post_ra>
